<compile_context>
chip_gen: v7x
topology: tpu7x:2x2x1
jax: 0.10.0
libtpu: 0.0.40
codegen_flags: <defaults>
</compile_context>

<pallas_src>
import jax
import jax.numpy as jnp
from jax.experimental import pallas as pl
from jax.experimental.pallas import tpu as pltpu


def _band_weight(w_hwio, W):
    """(3, 3, Ci, Co) conv weight -> (3, W*Ci, W*Co) per-kh band matrices.

    B[kh, wi*Ci+ci, wo*Co+co] = w[kh, wi-wo+1, ci, co] when wi-wo+1 in {0,1,2},
    else 0.  The zero 'same' padding along W is implicit in the band structure.
    """
    _, _, Ci, Co = w_hwio.shape
    # shift[kw, wi, wo] = 1  iff  wi == wo + kw - 1
    shift = jnp.stack([jnp.eye(W, k=1 - kw, dtype=w_hwio.dtype) for kw in range(3)])
    B = jnp.einsum('kxy,hkcd->hxcyd', shift, w_hwio)      # (3, W, Ci, W, Co)
    return B.reshape(3, W * Ci, W * Co)


def _basic_block_kernel(x_ref, w1_ref, b1_ref, w2_ref, b2_ref, o_ref):
    # x_ref : (1, H+2, W*Cin)   bf16  (zero-padded by 1 row top/bottom)
    # w1_ref: (3, W*Cin, W*Cmid) bf16  (BN1 scale folded in)
    # b1_ref: (1, W*Cmid)        f32
    # w2_ref: (3, W*Cmid, W*Cout) bf16 (BN2 scale folded in)
    # b2_ref: (1, W*Cout)        f32
    # o_ref : (1, H, W*Cout)     f32
    H = x_ref.shape[1] - 2
    WCm = w1_ref.shape[2]

    # ---- conv1 (+ folded BN1 scale): 3 accumulating band matmuls, one per kh ----
    acc1 = jnp.dot(x_ref[0, 0:H, :], w1_ref[0], preferred_element_type=jnp.float32)
    acc1 = acc1 + jnp.dot(x_ref[0, 1:H + 1, :], w1_ref[1],
                          preferred_element_type=jnp.float32)
    acc1 = acc1 + jnp.dot(x_ref[0, 2:H + 2, :], w1_ref[2],
                          preferred_element_type=jnp.float32)
    # BN1 bias + ReLU (f32), then bf16 for the second MXU pass
    mid = jnp.maximum(acc1 + b1_ref[...], 0.0).astype(jnp.bfloat16)   # (H, W*Cmid)

    # zero-row padding in H for conv2 (W padding already folded into w2 bands)
    zrow = jnp.zeros((1, WCm), jnp.bfloat16)
    midp = jnp.concatenate([zrow, mid, zrow], axis=0)                 # (H+2, W*Cmid)

    # ---- conv2 (+ folded BN2 scale) ----
    acc2 = jnp.dot(midp[0:H, :], w2_ref[0], preferred_element_type=jnp.float32)
    acc2 = acc2 + jnp.dot(midp[1:H + 1, :], w2_ref[1],
                          preferred_element_type=jnp.float32)
    acc2 = acc2 + jnp.dot(midp[2:H + 2, :], w2_ref[2],
                          preferred_element_type=jnp.float32)
    out = acc2 + b2_ref[...]                                          # BN2 bias (f32)

    # residual from the resident packed input rows (Cin == Cout -> same packing)
    res = x_ref[0, 1:H + 1, :].astype(jnp.float32)
    out = jnp.maximum(out + res, 0.0)                                 # add + ReLU
    o_ref[0] = out.astype(o_ref.dtype)


def basic_block_forward(x_nchw, w1_oihw, g1, be1, m1, v1,
                        w2_oihw, g2, be2, m2, v2, eps=1e-5):
    """Pallas implementation of BasicBlock.forward (stride=1, downsample=None)."""
    N, Cin, H, W = x_nchw.shape
    Cmid = w1_oihw.shape[0]
    Cout = w2_oihw.shape[0]
    assert Cout == Cin, "residual add requires inplanes == planes (stride=1 path)"

    # --- lane-dense packed input: NCHW f32 -> bf16 -> NHWC -> (N, H, W*Cin), pad H by 1
    xb = jnp.transpose(x_nchw.astype(jnp.bfloat16), (0, 2, 3, 1)).reshape(N, H, W * Cin)
    xp = jnp.pad(xb, ((0, 0), (1, 1), (0, 0)))                        # (N, H+2, W*Cin)

    # --- fold inference BN into per-channel scale/bias; scale goes into the weights
    w1 = jnp.transpose(w1_oihw, (2, 3, 1, 0)).astype(jnp.float32)     # HWIO (3,3,Cin,Cmid)
    w2 = jnp.transpose(w2_oihw, (2, 3, 1, 0)).astype(jnp.float32)     # HWIO (3,3,Cmid,Cout)
    s1 = g1 * jax.lax.rsqrt(v1 + eps)
    b1 = be1 - m1 * s1
    s2 = g2 * jax.lax.rsqrt(v2 + eps)
    b2 = be2 - m2 * s2

    B1 = _band_weight(w1 * s1[None, None, None, :], W).astype(jnp.bfloat16)  # (3, W*Cin, W*Cmid)
    B2 = _band_weight(w2 * s2[None, None, None, :], W).astype(jnp.bfloat16)  # (3, W*Cmid, W*Cout)
    b1p = jnp.tile(b1, W).reshape(1, W * Cmid).astype(jnp.float32)           # packed (wo, cm)
    b2p = jnp.tile(b2, W).reshape(1, W * Cout).astype(jnp.float32)           # packed (wo, co)

    out_packed = pl.pallas_call(
        _basic_block_kernel,
        out_shape=jax.ShapeDtypeStruct((N, H, W * Cout), jnp.float32),
        grid_spec=pltpu.PrefetchScalarGridSpec(
            num_scalar_prefetch=0,
            grid=(N,),
            in_specs=[
                pl.BlockSpec((1, H + 2, W * Cin), lambda n: (n, 0, 0)),
                pl.BlockSpec((3, W * Cin, W * Cmid), lambda n: (0, 0, 0)),
                pl.BlockSpec((1, W * Cmid), lambda n: (0, 0)),
                pl.BlockSpec((3, W * Cmid, W * Cout), lambda n: (0, 0, 0)),
                pl.BlockSpec((1, W * Cout), lambda n: (0, 0)),
            ],
            out_specs=pl.BlockSpec((1, H, W * Cout), lambda n: (n, 0, 0)),
        ),
        compiler_params=pltpu.CompilerParams(
            dimension_semantics=("parallel",)),
    )(xp, B1, b1p, B2, b2p)

    # unpack lanes: (N, H, W*Cout) -> NHWC -> NCHW
    out = out_packed.reshape(N, H, W, Cout)
    return jnp.transpose(out, (0, 3, 1, 2))


def ref_forward(x, w1, g1, be1, m1, v1, w2, g2, be2, m2, v2, eps=1e-5):
    """Plain-JAX reference mirroring the PyTorch module (inference-mode BN),
    with conv operands in bf16 / f32 accumulation to match the kernel."""
    dn = ('NCHW', 'OIHW', 'NCHW')

    def bn(y, g, b, m, v):
        g, b, m, v = (t[None, :, None, None] for t in (g, b, m, v))
        return (y - m) / jnp.sqrt(v + eps) * g + b

    xb = x.astype(jnp.bfloat16)
    y = jax.lax.conv_general_dilated(xb, w1.astype(jnp.bfloat16), (1, 1),
                                     [(1, 1), (1, 1)], dimension_numbers=dn,
                                     preferred_element_type=jnp.float32)
    y = jnp.maximum(bn(y, g1, be1, m1, v1), 0.0)
    y = jax.lax.conv_general_dilated(y.astype(jnp.bfloat16),
                                     w2.astype(jnp.bfloat16), (1, 1),
                                     [(1, 1), (1, 1)], dimension_numbers=dn,
                                     preferred_element_type=jnp.float32)
    y = bn(y, g2, be2, m2, v2)
    return jnp.maximum(y + xb.astype(jnp.float32), 0.0)


if __name__ == "__main__":
    # BasicBlock(inplanes=4, planes=4, stride=1, downsample=None)
    #   conv1: 4 -> 8 (planes*2), conv2: 8 -> 4
    N, Cin, H, W = 2, 4, 16, 16
    planes = 4
    Cmid, Cout = planes * 2, planes

    key = jax.random.PRNGKey(0)
    ks = jax.random.split(key, 11)
    x = jax.random.normal(ks[0], (N, Cin, H, W), jnp.float32)

    w1 = jax.random.normal(ks[1], (Cmid, Cin, 3, 3), jnp.float32) * 0.2   # OIHW
    w2 = jax.random.normal(ks[2], (Cout, Cmid, 3, 3), jnp.float32) * 0.2  # OIHW

    g1 = jax.random.uniform(ks[3], (Cmid,), jnp.float32, 0.5, 1.5)
    be1 = jax.random.normal(ks[4], (Cmid,), jnp.float32) * 0.1
    m1 = jax.random.normal(ks[5], (Cmid,), jnp.float32) * 0.1
    v1 = jax.random.uniform(ks[6], (Cmid,), jnp.float32, 0.5, 1.5)

    g2 = jax.random.uniform(ks[7], (Cout,), jnp.float32, 0.5, 1.5)
    be2 = jax.random.normal(ks[8], (Cout,), jnp.float32) * 0.1
    m2 = jax.random.normal(ks[9], (Cout,), jnp.float32) * 0.1
    v2 = jax.random.uniform(ks[10], (Cout,), jnp.float32, 0.5, 1.5)

    out = basic_block_forward(x, w1, g1, be1, m1, v1, w2, g2, be2, m2, v2)
    out = jax.block_until_ready(out)

    ref = ref_forward(x, w1, g1, be1, m1, v1, w2, g2, be2, m2, v2)
    assert out.shape == (N, Cout, H, W)
    assert jnp.allclose(out, ref, atol=2e-2, rtol=2e-2), (
        f"max abs err {jnp.max(jnp.abs(out - ref))}")

    print("KERNEL_OK")
</pallas_src>

<mosaic_0001>
module attributes {stable_mosaic.version = 11 : i64} {
  func.func @_basic_block_kernel(%arg0: i32, %arg1: memref<1x18x64xbf16, #tpu.memory_space<vmem>>, %arg2: memref<3x64x128xbf16, #tpu.memory_space<vmem>>, %arg3: memref<1x128xf32, #tpu.memory_space<vmem>>, %arg4: memref<3x128x64xbf16, #tpu.memory_space<vmem>>, %arg5: memref<1x64xf32, #tpu.memory_space<vmem>>, %arg6: memref<1x16x64xf32, #tpu.memory_space<vmem>>) attributes {dimension_semantics = [#tpu.dimension_semantics<parallel>], iteration_bounds = array<i64: 2>, scalar_prefetch = 0 : i64, scratch_operands = 0 : i64, tpu.core_type = #tpu.core_type<tc>, window_params = [{transform_indices = @transform_0, window_bounds = array<i64: 1, 18, 64>}, {pipeline_mode = #tpu.pipeline_mode<synchronous>, transform_indices = @transform_1, window_bounds = array<i64: 3, 64, 128>}, {pipeline_mode = #tpu.pipeline_mode<synchronous>, transform_indices = @transform_2, window_bounds = array<i64: 1, 128>}, {pipeline_mode = #tpu.pipeline_mode<synchronous>, transform_indices = @transform_3, window_bounds = array<i64: 3, 128, 64>}, {pipeline_mode = #tpu.pipeline_mode<synchronous>, transform_indices = @transform_4, window_bounds = array<i64: 1, 64>}, {transform_indices = @transform_5, window_bounds = array<i64: 1, 16, 64>}]} {
    %c0 = arith.constant 0 : index
    %c0_0 = arith.constant 0 : index
    %c0_1 = arith.constant 0 : index
    %0 = vector.load %arg1[%c0, %c0_0, %c0_1] : memref<1x18x64xbf16, #tpu.memory_space<vmem>>, vector<1x16x64xbf16>
    %1 = vector.shape_cast %0 : vector<1x16x64xbf16> to vector<16x64xbf16>
    %c0_2 = arith.constant 0 : index
    %c0_3 = arith.constant 0 : index
    %c0_4 = arith.constant 0 : index
    %2 = vector.load %arg2[%c0_2, %c0_3, %c0_4] : memref<3x64x128xbf16, #tpu.memory_space<vmem>>, vector<1x64x128xbf16>
    %3 = vector.shape_cast %2 : vector<1x64x128xbf16> to vector<64x128xbf16>
    %cst = arith.constant dense<0.000000e+00> : vector<16x128xf32>
    %4 = tpu.matmul %1, %3, %cst {dimension_numbers = #tpu.dot_dimension_numbers<[1], [0], [0], [1], [0, 0, 1, 1], [], []>} : vector<16x64xbf16>, vector<64x128xbf16>, vector<16x128xf32> -> vector<16x128xf32>
    %c0_5 = arith.constant 0 : index
    %c1 = arith.constant 1 : index
    %c0_6 = arith.constant 0 : index
    %5 = vector.load %arg1[%c0_5, %c1, %c0_6] : memref<1x18x64xbf16, #tpu.memory_space<vmem>>, vector<1x16x64xbf16>
    %6 = vector.shape_cast %5 : vector<1x16x64xbf16> to vector<16x64xbf16>
    %c1_7 = arith.constant 1 : index
    %c0_8 = arith.constant 0 : index
    %c0_9 = arith.constant 0 : index
    %7 = vector.load %arg2[%c1_7, %c0_8, %c0_9] : memref<3x64x128xbf16, #tpu.memory_space<vmem>>, vector<1x64x128xbf16>
    %8 = vector.shape_cast %7 : vector<1x64x128xbf16> to vector<64x128xbf16>
    %cst_10 = arith.constant dense<0.000000e+00> : vector<16x128xf32>
    %9 = tpu.matmul %6, %8, %cst_10 {dimension_numbers = #tpu.dot_dimension_numbers<[1], [0], [0], [1], [0, 0, 1, 1], [], []>} : vector<16x64xbf16>, vector<64x128xbf16>, vector<16x128xf32> -> vector<16x128xf32>
    %10 = arith.addf %4, %9 : vector<16x128xf32>
    %c0_11 = arith.constant 0 : index
    %c2 = arith.constant 2 : index
    %c0_12 = arith.constant 0 : index
    %11 = vector.load %arg1[%c0_11, %c2, %c0_12] : memref<1x18x64xbf16, #tpu.memory_space<vmem>>, vector<1x16x64xbf16>
    %12 = vector.shape_cast %11 : vector<1x16x64xbf16> to vector<16x64xbf16>
    %c2_13 = arith.constant 2 : index
    %c0_14 = arith.constant 0 : index
    %c0_15 = arith.constant 0 : index
    %13 = vector.load %arg2[%c2_13, %c0_14, %c0_15] : memref<3x64x128xbf16, #tpu.memory_space<vmem>>, vector<1x64x128xbf16>
    %14 = vector.shape_cast %13 : vector<1x64x128xbf16> to vector<64x128xbf16>
    %cst_16 = arith.constant dense<0.000000e+00> : vector<16x128xf32>
    %15 = tpu.matmul %12, %14, %cst_16 {dimension_numbers = #tpu.dot_dimension_numbers<[1], [0], [0], [1], [0, 0, 1, 1], [], []>} : vector<16x64xbf16>, vector<64x128xbf16>, vector<16x128xf32> -> vector<16x128xf32>
    %16 = arith.addf %10, %15 : vector<16x128xf32>
    %c0_17 = arith.constant 0 : index
    %c0_18 = arith.constant 0 : index
    %17 = vector.load %arg3[%c0_17, %c0_18] : memref<1x128xf32, #tpu.memory_space<vmem>>, vector<1x128xf32>
    %18 = vector.broadcast %17 : vector<1x128xf32> to vector<16x128xf32>
    %19 = arith.addf %16, %18 : vector<16x128xf32>
    %cst_19 = arith.constant 0.000000e+00 : f32
    %20 = vector.broadcast %cst_19 : f32 to vector<16x128xf32>
    %21 = arith.maximumf %19, %20 : vector<16x128xf32>
    %22 = arith.truncf %21 : vector<16x128xf32> to vector<16x128xbf16>
    %cst_20 = arith.constant 0.000000e+00 : bf16
    %23 = vector.broadcast %cst_20 : bf16 to vector<1x128xbf16>
    %24 = tpu.concatenate %23, %22, %23 in 0 : vector<1x128xbf16>, vector<16x128xbf16>, vector<1x128xbf16> -> vector<18x128xbf16>
    %25 = vector.extract_strided_slice %24 {offsets = [0, 0], sizes = [16, 128], strides = [1, 1]} : vector<18x128xbf16> to vector<16x128xbf16>
    %c0_21 = arith.constant 0 : index
    %c0_22 = arith.constant 0 : index
    %c0_23 = arith.constant 0 : index
    %26 = vector.load %arg4[%c0_21, %c0_22, %c0_23] : memref<3x128x64xbf16, #tpu.memory_space<vmem>>, vector<1x128x64xbf16>
    %27 = vector.shape_cast %26 : vector<1x128x64xbf16> to vector<128x64xbf16>
    %cst_24 = arith.constant dense<0.000000e+00> : vector<16x64xf32>
    %28 = tpu.matmul %25, %27, %cst_24 {dimension_numbers = #tpu.dot_dimension_numbers<[1], [0], [0], [1], [0, 0, 1, 1], [], []>} : vector<16x128xbf16>, vector<128x64xbf16>, vector<16x64xf32> -> vector<16x64xf32>
    %29 = vector.extract_strided_slice %24 {offsets = [1, 0], sizes = [16, 128], strides = [1, 1]} : vector<18x128xbf16> to vector<16x128xbf16>
    %c1_25 = arith.constant 1 : index
    %c0_26 = arith.constant 0 : index
    %c0_27 = arith.constant 0 : index
    %30 = vector.load %arg4[%c1_25, %c0_26, %c0_27] : memref<3x128x64xbf16, #tpu.memory_space<vmem>>, vector<1x128x64xbf16>
    %31 = vector.shape_cast %30 : vector<1x128x64xbf16> to vector<128x64xbf16>
    %cst_28 = arith.constant dense<0.000000e+00> : vector<16x64xf32>
    %32 = tpu.matmul %29, %31, %cst_28 {dimension_numbers = #tpu.dot_dimension_numbers<[1], [0], [0], [1], [0, 0, 1, 1], [], []>} : vector<16x128xbf16>, vector<128x64xbf16>, vector<16x64xf32> -> vector<16x64xf32>
    %33 = arith.addf %28, %32 : vector<16x64xf32>
    %34 = vector.extract_strided_slice %24 {offsets = [2, 0], sizes = [16, 128], strides = [1, 1]} : vector<18x128xbf16> to vector<16x128xbf16>
    %c2_29 = arith.constant 2 : index
    %c0_30 = arith.constant 0 : index
    %c0_31 = arith.constant 0 : index
    %35 = vector.load %arg4[%c2_29, %c0_30, %c0_31] : memref<3x128x64xbf16, #tpu.memory_space<vmem>>, vector<1x128x64xbf16>
    %36 = vector.shape_cast %35 : vector<1x128x64xbf16> to vector<128x64xbf16>
    %cst_32 = arith.constant dense<0.000000e+00> : vector<16x64xf32>
    %37 = tpu.matmul %34, %36, %cst_32 {dimension_numbers = #tpu.dot_dimension_numbers<[1], [0], [0], [1], [0, 0, 1, 1], [], []>} : vector<16x128xbf16>, vector<128x64xbf16>, vector<16x64xf32> -> vector<16x64xf32>
    %38 = arith.addf %33, %37 : vector<16x64xf32>
    %c0_33 = arith.constant 0 : index
    %c0_34 = arith.constant 0 : index
    %39 = vector.load %arg5[%c0_33, %c0_34] : memref<1x64xf32, #tpu.memory_space<vmem>>, vector<1x64xf32>
    %40 = vector.broadcast %39 : vector<1x64xf32> to vector<16x64xf32>
    %41 = arith.addf %38, %40 : vector<16x64xf32>
    %c0_35 = arith.constant 0 : index
    %c1_36 = arith.constant 1 : index
    %c0_37 = arith.constant 0 : index
    %42 = vector.load %arg1[%c0_35, %c1_36, %c0_37] : memref<1x18x64xbf16, #tpu.memory_space<vmem>>, vector<1x16x64xbf16>
    %43 = vector.shape_cast %42 : vector<1x16x64xbf16> to vector<16x64xbf16>
    %44 = arith.extf %43 : vector<16x64xbf16> to vector<16x64xf32>
    %45 = arith.addf %41, %44 : vector<16x64xf32>
    %cst_38 = arith.constant 0.000000e+00 : f32
    %46 = vector.broadcast %cst_38 : f32 to vector<16x64xf32>
    %47 = arith.maximumf %45, %46 : vector<16x64xf32>
    %c0_39 = arith.constant 0 : index
    %c0_40 = arith.constant 0 : index
    %c0_41 = arith.constant 0 : index
    %48 = vector.load %arg6[%c0_39, %c0_40, %c0_41] : memref<1x16x64xf32, #tpu.memory_space<vmem>>, vector<1x16x64xf32>
    %49 = vector.shape_cast %48 : vector<1x16x64xf32> to vector<16x64xf32>
    %50 = vector.shape_cast %47 : vector<16x64xf32> to vector<1x16x64xf32>
    tpu.vector_store %arg6[%c0_39, %c0_40, %c0_41], %50 {strides = array<i32>} : memref<1x16x64xf32, #tpu.memory_space<vmem>>, vector<1x16x64xf32>,
    return
  }
  func.func @transform_0(%arg0: i32) -> (i32, i32, i32) {
    %c0_i32 = arith.constant 0 : i32
    %c0_i32_0 = arith.constant 0 : i32
    %c0_i32_1 = arith.constant 0 : i32
    return %arg0, %c0_i32, %c0_i32_0 : i32, i32, i32
  }
  func.func @transform_1(%arg0: i32) -> (i32, i32, i32) {
    %c0_i32 = arith.constant 0 : i32
    %c0_i32_0 = arith.constant 0 : i32
    %c0_i32_1 = arith.constant 0 : i32
    %c0_i32_2 = arith.constant 0 : i32
    return %c0_i32, %c0_i32_0, %c0_i32_1 : i32, i32, i32
  }
  func.func @transform_2(%arg0: i32) -> (i32, i32) {
    %c0_i32 = arith.constant 0 : i32
    %c0_i32_0 = arith.constant 0 : i32
    %c0_i32_1 = arith.constant 0 : i32
    return %c0_i32, %c0_i32_0 : i32, i32
  }
  func.func @transform_3(%arg0: i32) -> (i32, i32, i32) {
    %c0_i32 = arith.constant 0 : i32
    %c0_i32_0 = arith.constant 0 : i32
    %c0_i32_1 = arith.constant 0 : i32
    %c0_i32_2 = arith.constant 0 : i32
    return %c0_i32, %c0_i32_0, %c0_i32_1 : i32, i32, i32
  }
  func.func @transform_4(%arg0: i32) -> (i32, i32) {
    %c0_i32 = arith.constant 0 : i32
    %c0_i32_0 = arith.constant 0 : i32
    %c0_i32_1 = arith.constant 0 : i32
    return %c0_i32, %c0_i32_0 : i32, i32
  }
  func.func @transform_5(%arg0: i32) -> (i32, i32, i32) {
    %c0_i32 = arith.constant 0 : i32
    %c0_i32_0 = arith.constant 0 : i32
    %c0_i32_1 = arith.constant 0 : i32
    return %arg0, %c0_i32, %c0_i32_0 : i32, i32, i32
  }
}

</mosaic_0001>

<bundles_post_ra>
// kernel: tpu_custom_call.1
= control target key start
LH: loop header
LB: loop body
LE: loop exit
PB: predicated region body
PF: predicated region fallthrough
CT: control target
= control target key end

     0   :  { %10 = vsyncpa [#allocation3], 0  ;;  %s1671_s0 = inlined_call_operand.vmem [shape: bf16[2,18,64], index: 0, kind: input, shape index: {}]   ;;  %s1672_s1 = inlined_call_operand.vmem [shape: bf16[3,64,128], index: 1, kind: input, shape index: {}]   ;;  %s1673_s2 = inlined_call_operand.vmem [shape: f32[1,128], index: 2, kind: input, shape index: {}]   ;;  %s1674_s3 = inlined_call_operand.vmem [shape: bf16[3,128,64], index: 3, kind: input, shape index: {}]   ;;  %s1675_s4 = inlined_call_operand.vmem [shape: f32[1,64], index: 4, kind: input, shape index: {}]   ;;  %s1676_s5 = inlined_call_operand.hbm [shape: f32[2,16,64], index: 5, kind: output, shape index: {}]  }
   0x1   :  { %12 = vsyncpa [#allocation3 + $0x1], 0  ;;  %s1381_s18 = smov 0   ;;  %s1383_s19 = smov 0  }
   0x2   :  { %s1385_s20 = smov 0   ;;  %s1387_s21 = smov 0  }
   0x3 LB: > { %s1402_s22 = sadd.s32 4294967295, %s1344_s21   ;;  %s957_s23 = sadd.s32 4294967294, %s1344_s21   ;;  %s1344_s21 = sphi %s1387_s21, %s1682_s21   ;;  %s1340_s20 = sphi %s1385_s20, %s1681_s20   ;;  %s1336_s19 = sphi %s1383_s19, %s1680_s19   ;;  %s1332_s18 = sphi %s1381_s18, %s1679_s18  }
   0x4   : > { %s1406_s24 = sadd.s32 1, %s1344_s21   ;;  %s135_s25 = sadd.s32 1, %s1340_s20 }
   0x5   : > { %s132_s26 = ssub.s32 %s1344_s21, %s1406_s24  ;;  %p145_p0 = scmp.ne.s32.totalorder %s1340_s20, %s1336_s19 }
   0x6   : > { %p133_p1 = scmp.eq.s32.totalorder %s132_s26, 0  ;;  %p146_p2 = scmp.eq.s32.totalorder %s1402_s22, 1 }
   0x7   : > { %p151_p3 = scmp.ne.s32.totalorder %s1336_s19, %s1332_s18  ;;  %p152_p4 = scmp.eq.s32.totalorder %s957_s23, 1 }
   0x8   : > { %s1417_s27 = scalar_select %p133_p1, %s1340_s20, %s135_s25  }
   0x9   : > { %p1419_p5 = por %p146_p2, %p145_p0  ;;  %p1423_p6 = por %p152_p4, %p151_p3 }
   0xa   : > { %p960_p7 = scmp.ge.s32.totalorder %s1344_s21, 1  ;;  %p190_p8 = scmp.lt.s32.totalorder %s1344_s21, 3 }
   0xc   : > { %p191_p9 = pnand %p960_p7, %p190_p8 }
   0xd   : > { %v1243_v0 = vld [vmem:[%s1672_s1 + $0x20] sm:$0xff] (!%p191_p9)   ;;  %v1346_v1 = vmov (!%p191_p9), 0.0   ;;  %v1245_v3 = vld [vmem:[%s1672_s1 + $0x28] sm:$0xff] (!%p191_p9)   ;;  %vm1347_vm0 = vmmov (!%p191_p9), 0   ;;  %p218_p10 = scmp.lt.s32.totalorder (!%p191_p9), %s1402_s22, 1  ;;  %v1247_v5 = vld [vmem:[%s1672_s1 + $0x30] sm:$0xff] (!%p191_p9)  }
   0xe   : > { %194 = sbr.rel (%p191_p9) target bundleno = 557 (0x22d), region = 40  ;;  %1103 = vmatprep.subr.bf16.mxu0 (!%p191_p9), %v1346_v1  ;;  %1115 = vmatprep.subr.bf16.mxu1 (!%p191_p9), %v1346_v1  ;;  %v1244_v2 = vld [vmem:[%s1672_s1] sm:$0xff] (!%p191_p9)   ;;  %v1246_v4 = vld [vmem:[%s1672_s1 + $0x8] sm:$0xff] (!%p191_p9)   ;;  %v1248_v6 = vld [vmem:[%s1672_s1 + $0x10] sm:$0xff] (!%p191_p9)   ;;  %vm289_vm1 = vcmask (!%p191_p9), 523264   ;;  %vm414_vm3 = vcmask (!%p191_p9), 1046528  }
   0xf   : > { %1104 = vmatpush3.bf16.msra.mxu0 (!%p191_p9), %v1243_v0  ;;  %1111 = vmatprep.mubr.msk.bf16.mxu0 (!%p191_p9), %vm1347_vm0, %v1346_v1  ;;  %v1249_v10 = vld [vmem:[%s1672_s1 + $0x38] sm:$0xff] (!%p191_p9)   ;;  %vm252_vm2 = vsmask.f32 (!%p191_p9), 7424  ;;  %v1253_v20 = vld [vmem:[%s1672_s1 + $0x40] sm:$0xff] (!%p191_p9)   ;;  %v1254_v26 = vld [vmem:[%s1672_s1 + $0x48] sm:$0xff] (!%p191_p9)   ;;  %vm509_vm4 = vcmask (!%p191_p9), 1040384  }
  0x10   : > { %1116 = vmatpush3.bf16.msra.mxu1 (!%p191_p9), %v1244_v2  ;;  %1105 = vmatprep.subr.bf16.mxu0 (!%p191_p9), %v1346_v1  ;;  %v1250_v13 = vld [vmem:[%s1672_s1 + $0x18] sm:$0xff] (!%p191_p9)   ;;  %v1255_v27 = vld [vmem:[%s1672_s1 + $0x50] sm:$0xff] (!%p191_p9)   ;;  %v1258_v30 = vld [vmem:[%s1674_s3] sm:$0xff] (!%p191_p9)   ;;  %vm510_vm5 = vsmask.f32 (!%p191_p9), 256  ;;  %s215_s26 = sand.u32 (!%p191_p9), 1, %s1336_s19  }
  0x11   : > { %1117 = vmatprep.subr.bf16.mxu1 (!%p191_p9), %v1346_v1  ;;  %1123 = vmatprep.mubr.msk.bf16.mxu1 (!%p191_p9), %vm1347_vm0, %v1346_v1  ;;  %v1256_v28 = vld [vmem:[%s1672_s1 + $0x58] sm:$0xff] (!%p191_p9)   ;;  %v1259_v31 = vld [vmem:[%s1674_s3 + $0x8] sm:$0xff] (!%p191_p9)   ;;  %v1260_v32 = vld [vmem:[%s1674_s3 + $0x40] sm:$0xff] (!%p191_p9)   ;;  %s1060_s8 = sshll.u32 (!%p191_p9), %s1402_s22, 8  ;;  %s1348_s15 = smov (!%p191_p9), [#allocation2]  }
  0x12   : > { %v1262_v33 = vld [vmem:[%s1674_s3 + $0x48] sm:$0xff] (!%p191_p9)   ;;  %v1261_v34 = vld [vmem:[%s1674_s3 + $0x10] sm:$0xff] (!%p191_p9)   ;;  %v1263_v35 = vld [vmem:[%s1674_s3 + $0x18] sm:$0xff] (!%p191_p9)  }
  0x13   : > { %1106 = vmatpush3.bf16.msra.mxu0 (!%p191_p9), %v1245_v3  ;;  %v1264_v36 = vld [vmem:[%s1674_s3 + $0x50] sm:$0xff] (!%p191_p9)   ;;  %v1265_v37 = vld [vmem:[%s1674_s3 + $0x20] sm:$0xff] (!%p191_p9)   ;;  %v1266_v38 = vld [vmem:[%s1674_s3 + $0x58] sm:$0xff] (!%p191_p9)  }
  0x14   : > { %1118 = vmatpush3.bf16.msra.mxu1 (!%p191_p9), %v1246_v4  ;;  %1107 = vmatprep.subr.bf16.mxu0 (!%p191_p9), %v1346_v1  ;;  %v1267_v39 = vld [vmem:[%s1674_s3 + $0x28] sm:$0xff] (!%p191_p9)   ;;  %v1268_v40 = vld [vmem:[%s1674_s3 + $0x60] sm:$0xff] (!%p191_p9)   ;;  %v1269_v41 = vld [vmem:[%s1674_s3 + $0x30] sm:$0xff] (!%p191_p9)  }
  0x15   : > { %s219_s13 = scalar_select %p218_p10, %s1402_s22, 1  ;;  %1119 = vmatprep.subr.bf16.mxu1 %v1346_v1  ;;  %v1270_v42 = vld [vmem:[%s1674_s3 + $0x68] sm:$0xff]   ;;  %v1271_v43 = vld [vmem:[%s1674_s3 + $0x38] sm:$0xff]   ;;  %v1272_v44 = vld [vmem:[%s1674_s3 + $0x70] sm:$0xff]  }
  0x16   : > { %v1273_v45 = vld [vmem:[%s1674_s3 + $0x78] sm:$0xff]   ;;  %v997_v57 = vld [vmem:[%s1673_s2] ss:$0 sm:$0xff]  ;;  %vm511_vm6 = vmand %vm509_vm4, %vm510_vm5  ;;  %s1630_s22 = scalar_lea.sflag [#allocation3], %s215_s26 }
  0x17   : > { %s1199_s16 = smul.u32 12, %s219_s13  ;;  %1108 = vmatpush3.bf16.msra.mxu0 %v1247_v5  ;;  %s1624_s13 = scalar_lea.hbm %s1676_s5, %s1060_s8 }
  0x18   : > { %1120 = vmatpush3.bf16.msra.mxu1 %v1248_v6  ;;  %1109 = vmatprep.subr.bf16.mxu0 %v1346_v1 }
  0x19   : > { %s222_s30 = scalar_lea.vmem %s1671_s0, %s1199_s16  ;;  %1121 = vmatprep.subr.bf16.mxu1 %v1346_v1  ;;  %s1286_s16 = sshll.u32 %s1348_s15, 4  ;;  %s1287_s16 = int_to_ptr.vmem [resolvable:$false] %s1286_s16 }
  0x1a   : > { %v1462_v7 = vld [vmem:[%s222_s30] sm:$0xf]  ;;  %v1464_v8 = vld [vmem:[%s222_s30 + $0x4] sm:$0xf]  ;;  %v1466_v9 = vld [vmem:[%s222_s30 + $0x8] sm:$0x1] }
  0x1b   : > { %v971_v11 = vcombine.low %v1462_v7, %v1464_v8  ;;  %v972_v12 = vcombine.low %v1466_v9, %v1466_v9  ;;  %v401_v17 = vld [vmem:[%s222_s30] sm:$0xe]  ;;  %1110 = vmatpush3.bf16.msra.mxu0 %v1249_v10  ;;  %s961_s30 = sshll.u32 %s215_s26, 4  ;;  %s1288_s17 = scalar_lea.vmem %s1287_s16, 512 }
  0x1c   : > { %v991_v21 = vcombine.low %v401_v17, %v1464_v8  ;;  %1122 = vmatpush3.bf16.msra.mxu1 %v1250_v13  ;;  %1127 = vmatprep.subr.bf16.mxu0 %v1346_v1  ;;  %s217_s9 = scalar_lea.vmem [#allocation2], %s961_s30 }
  0x1d   : > { %v254_v14 = vshrl.u32 %v971_v11, 16  ;;  %v256_v15 = vshll.u32 %v971_v11, 16  ;;  %v261_v16 = vshll.u32 %v972_v12, 16  ;;  %v416_v24 = vrot.slane %v972_v12, 1  ;;  %1139 = vmatprep.subr.bf16.mxu1 %v1346_v1  ;;  %s895_s10 = sshll.u32 %s217_s9, 4  ;;  %s1626_s10 = int_to_ptr.vmem [resolvable:$true] %s895_s10 }
  0x1e   : > { %v415_v23 = vrot.slane %v991_v21, 1  ;;  %s1282_s14 = scalar_lea.vmem %s1626_s10, 256  ;;  %p1289_p0 = scmp.lt.s32.totalorder %s1626_s10, %s1287_s16 }
  0x1f   : > { %v258_v18 = vrot.slane %v256_v15, 1  ;;  %v263_v19 = vrot.slane %v261_v16, 1  ;;  %1124 = vmatmul.mubr.msk.bf16.vlgmr.msra.gmra.mrb[0].mxu1 %vm289_vm1, %v971_v11  ;;  %p1283_p11 = scmp.ne.s32.totalorder %s1626_s10, %s1282_s14  ;;  %p1290_p1 = scmp.lt.s32.totalorder %s1288_s17, %s1282_s14 }
  0x20   : > { %1155 = vmatprep.mubr.msk.bf16.mxu1 %vm1347_vm0, %v1346_v1  ;;  %v417_v29 = vsel %vm414_vm3, %v415_v23, %v416_v24  ;;  %1140 = vmatpush3.bf16.msra.mxu1 %v1260_v32  ;;  %v1276_v23 = vld [vmem:[%s1674_s3 + $0x90] sm:$0xff]   ;;  %v1277_v24 = vld [vmem:[%s1674_s3 + $0x98] sm:$0xff]  }
  0x21   : > { %v259_v22 = vor.u32 %v258_v18, %v254_v14  ;;  %1141 = vmatprep.subr.bf16.mxu1 %v1346_v1  ;;  %p1284_p12 = pnand %p1283_p11, %p1419_p5  ;;  %p1291_p2 = por %p1290_p1, %p1289_p0 }
  0x23   : > { %v264_v25 = vsel %vm252_vm2, %v259_v22, %v263_v19  ;;  %v1275_v22 = vld [vmem:[%s1674_s3 + $0x88] sm:$0xff]   ;;  %p1285_p13 = pneg %p1284_p12 }
  0x24   : > { %1112 = vmatmul.mubr.msk.bf16.vlgmr.msra.gmra.mrb[0].mxu0 %vm289_vm1, %v264_v25  ;;  %1142 = vmatpush3.bf16.msra.mxu1 %v1262_v33  ;;  %v1278_v25 = vld [vmem:[%s1674_s3 + $0xa0] sm:$0xff]  }
  0x25   : > { %1128 = vmatpush3.bf16.msra.mxu0 %v1253_v20  ;;  %1135 = vmatprep.mubr.msk.bf16.mxu0 %vm1347_vm0, %v1346_v1  ;;  %v1274_v20 = vld [vmem:[%s1674_s3 + $0x80] sm:$0xff]   ;;  %p1292_p3 = pnand %p1291_p2, %p1285_p13 }
  0x26   : > { %1129 = vmatprep.subr.bf16.mxu0 %v1346_v1  ;;  %1143 = vmatprep.subr.bf16.mxu1 %v1346_v1 }
  0x28   : > { %1144 = vmatpush3.bf16.msra.mxu1 %v1264_v36 }
  0x29   : > { %1130 = vmatpush3.bf16.msra.mxu0 %v1254_v26  ;;  %1145 = vmatprep.subr.bf16.mxu1 %v1346_v1  ;;  %v1279_v26 = vld [vmem:[%s1674_s3 + $0xa8] sm:$0xff]  }
  0x2a   : > { %1131 = vmatprep.subr.bf16.mxu0 %v1346_v1 }
  0x2c   : > { %1146 = vmatpush3.bf16.msra.mxu1 %v1266_v38 }
  0x2d   : > { %1132 = vmatpush3.bf16.msra.mxu0 %v1255_v27  ;;  %1147 = vmatprep.subr.bf16.mxu1 %v1346_v1  ;;  %v1280_v27 = vld [vmem:[%s1674_s3 + $0xb0] sm:$0xff]  }
  0x2e   : > { %1133 = vmatprep.subr.bf16.mxu0 %v1346_v1 }
  0x30   : > { %1148 = vmatpush3.bf16.msra.mxu1 %v1268_v40 }
  0x31   : > { %1134 = vmatpush3.bf16.msra.mxu0 %v1256_v28  ;;  %1149 = vmatprep.subr.bf16.mxu1 %v1346_v1  ;;  %v1281_v28 = vld [vmem:[%s1674_s3 + $0xb8] sm:$0xff]  }
  0x32   : > { %1159 = vmatprep.subr.bf16.mxu0 %v1346_v1 }
  0x34   : > { %1136 = vmatmul.mubr.msk.bf16.vlgmr.msra.gmra.mrb[4].mxu0 %vm289_vm1, %v417_v29  ;;  %1150 = vmatpush3.bf16.msra.mxu1 %v1270_v42  ;;  %v861_v42 = vunpack.c.l.bf16 %v1462_v7 }
  0x35   : > { %1175 = vmatprep.mubr.msk.bf16.mxu0 %vm1347_vm0, %v1346_v1  ;;  %1160 = vmatpush3.bf16.msra.mxu0 %v1258_v30 }
  0x36   : > { %1161 = vmatprep.subr.bf16.mxu0 %v1346_v1  ;;  %1151 = vmatprep.subr.bf16.mxu1 %v1346_v1 }
  0x38   : > { %1152 = vmatpush3.bf16.msra.mxu1 %v1272_v44  ;;  %v868_v44 = vrot.slane %v861_v42, 1 }
  0x39   : > { %1162 = vmatpush3.bf16.msra.mxu0 %v1259_v31  ;;  %1153 = vmatprep.subr.bf16.mxu1 %v1346_v1 }
  0x3a   : > { %1163 = vmatprep.subr.bf16.mxu0 %v1346_v1 }
  0x3c   : > { %1154 = vmatpush3.bf16.msra.mxu1 %v1273_v45 }
  0x3d   : > { %1164 = vmatpush3.bf16.msra.mxu0 %v1261_v34  ;;  %1179 = vmatprep.subr.bf16.mxu1 %v1346_v1 }
  0x3e   : > { %1165 = vmatprep.subr.bf16.mxu0 %v1346_v1 }
  0x41   : > { %1166 = vmatpush3.bf16.msra.mxu0 %v1263_v35 }
  0x42   : > { %1167 = vmatprep.subr.bf16.mxu0 %v1346_v1 }
  0x45   : > { %1168 = vmatpush3.bf16.msra.mxu0 %v1265_v37 }
  0x46   : > { %1169 = vmatprep.subr.bf16.mxu0 %v1346_v1 }
  0x49   : > { %1170 = vmatpush3.bf16.msra.mxu0 %v1267_v39 }
  0x4a   : > { %1171 = vmatprep.subr.bf16.mxu0 %v1346_v1 }
  0x4d   : > { %1172 = vmatpush3.bf16.msra.mxu0 %v1269_v41 }
  0x4e   : > { %1173 = vmatprep.subr.bf16.mxu0 %v1346_v1 }
  0x51   : > { %1174 = vmatpush3.bf16.msra.mxu0 %v1271_v43  ;;  %v863_v43 = vunpack.c.l.bf16 %v1466_v9 }
  0xf2   : > { %v394_v46 = vpop.f32.mrb[0].mxu1 }
  0xf3   : > { %v1125_v48 = vpop.f32.mrb[1].mxu1 }
  0xf4   : > { %v397_v51 = vpop.f32.mrb[2].mxu1  ;;  %v871_v48 = vrot.slane %v863_v43, 1 }
  0xf5   : > { %v1126_v53 = vpop.f32.mrb[3].mxu1 }
  0xf7   : > { %v327_v47 = vpop.f32.mrb[0].mxu0 }
  0xf8   : > { %v395_v49 = vadd.f32 %v394_v46, %v327_v47  ;;  %v1113_v50 = vpop.f32.mrb[1].mxu0  ;;  %v1054_v47 = vld [vmem:[%s1675_s4] ss:$0 sm:$0xff] }
  0xf9   : > { %v330_v52 = vpop.f32.mrb[2].mxu0 }
  0xfa   : > { %v398_v54 = vadd.f32 %v397_v51, %v330_v52  ;;  %v1114_v55 = vpop.f32.mrb[3].mxu0 }
 0x107   : > { %v479_v56 = vpop.f32.mrb[4].mxu0 }
 0x108   : > { %v486_v58 = vadd.f32 %v479_v56, %v395_v49  ;;  %v1137_v59 = vpop.f32.mrb[5].mxu0 }
 0x109   : > { %v482_v60 = vpop.f32.mrb[6].mxu0 }
 0x10a   : > { %v495_v61 = vadd.f32 %v997_v57, %v486_v58  ;;  %v487_v62 = vadd.f32 %v482_v60, %v398_v54  ;;  %v1138_v63 = vpop.f32.mrb[7].mxu0 }
 0x10c   : > { %v496_v0 = vadd.f32 %v997_v57, %v487_v62  ;;  %v497_v2 = vmax.f32 %v495_v61, 0.0 }
 0x10e   : > { %v498_v3 = vmax.f32 %v496_v0, 0.0 }
 0x110   : > { %v499_v4 = vpack.c.bf16 %v498_v3, %v497_v2 }
 0x112   : > { %v501_v5 = vshrl.u32 %v499_v4, 16  ;;  %v504_v6 = vshll.u32 %v499_v4, 16 }
 0x114   : > { %v503_v10 = vrot.slane %v501_v5, 7 }
 0x116   : > { %v506_v11 = vor.u32 %v504_v6, %v503_v10  ;;  %v513_v12 = vsel %vm511_vm6, %v503_v10, 0 }
 0x117   : > { %v555_v15 = vshll.u32 %v513_v12, 16  ;;  %v758_v30 = vrot.slane %v513_v12, 1 }
 0x118   : > { %v512_v13 = vsel %vm511_vm6, 0, %v506_v11 }
 0x119   : > { %v550_v14 = vshll.u32 %v512_v13, 16  ;;  %1176 = vmatmul.mubr.bf16.vlgmr.msra.gmra.mrb[8].mxu0 %v512_v13  ;;  %v548_v16 = vshrl.u32 %v512_v13, 16  ;;  %v557_v18 = vrot.slane %v555_v15, 1  ;;  %v757_v29 = vrot.slane %v512_v13, 1 }
 0x11b   : > { %v552_v17 = vrot.slane %v550_v14, 1  ;;  %v759_v31 = vsel %vm414_vm3, %v757_v29, %v758_v30 }
 0x11d   : > { %v553_v19 = vor.u32 %v552_v17, %v548_v16 }
 0x11f   : > { %v558_v21 = vsel %vm252_vm2, %v553_v19, %v557_v18 }
 0x120   : > { %1156 = vmatmul.mubr.bf16.vlgmr.msra.gmra.mrb[4].mxu1 %v558_v21 }
 0x121   : > { %1180 = vmatpush3.bf16.msra.mxu1 %v1274_v20  ;;  %1195 = vmatprep.mubr.msk.bf16.mxu1 %vm1347_vm0, %v1346_v1 }
 0x122   : > { %1181 = vmatprep.subr.bf16.mxu1 %v1346_v1 }
 0x125   : > { %1182 = vmatpush3.bf16.msra.mxu1 %v1275_v22 }
 0x126   : > { %1183 = vmatprep.subr.bf16.mxu1 %v1346_v1 }
 0x129   : > { %1184 = vmatpush3.bf16.msra.mxu1 %v1276_v23 }
 0x12a   : > { %1185 = vmatprep.subr.bf16.mxu1 %v1346_v1 }
 0x12d   : > { %1186 = vmatpush3.bf16.msra.mxu1 %v1277_v24 }
 0x12e   : > { %1187 = vmatprep.subr.bf16.mxu1 %v1346_v1 }
 0x131   : > { %1188 = vmatpush3.bf16.msra.mxu1 %v1278_v25 }
 0x132   : > { %1189 = vmatprep.subr.bf16.mxu1 %v1346_v1 }
 0x135   : > { %1190 = vmatpush3.bf16.msra.mxu1 %v1279_v26 }
 0x136   : > { %1191 = vmatprep.subr.bf16.mxu1 %v1346_v1 }
 0x139   : > { %1192 = vmatpush3.bf16.msra.mxu1 %v1280_v27 }
 0x13a   : > { %1193 = vmatprep.subr.bf16.mxu1 %v1346_v1  ;;  %v862_v1 = vunpack.c.l.bf16 %v1464_v8 }
 0x13c   : > { %v869_v45 = vrot.slane %v862_v1, 1 }
 0x13d   : > { %1194 = vmatpush3.bf16.msra.mxu1 %v1281_v28 }
 0x13e   : > { %v870_v51 = vsel %vm414_vm3, %v868_v44, %v869_v45  ;;  %v872_v9 = vsel %vm414_vm3, %v869_v45, %v871_v48 }
 0x140   : > { %1196 = vmatmul.mubr.bf16.vlgmr.msra.gmra.mrb[8].mxu1 %v759_v31 }
 0x1ec   : > { %v731_v32 = vpop.f32.mrb[8].mxu0 }
 0x1ed   : > { %v1177_v33 = vpop.f32.mrb[9].mxu0 }
 0x1ee   : > { %v734_v34 = vpop.f32.mrb[10].mxu0 }
 0x1ef   : > { %v1178_v35 = vpop.f32.mrb[11].mxu0 }
 0x1f3   : > { %v642_v36 = vpop.f32.mrb[4].mxu1 }
 0x1f4   : > { %v732_v37 = vadd.f32 %v731_v32, %v642_v36  ;;  %v1157_v38 = vpop.f32.mrb[5].mxu1 }
 0x1f5   : > { %v645_v39 = vpop.f32.mrb[6].mxu1 }
 0x1f6   : > { %v735_v40 = vadd.f32 %v734_v34, %v645_v39  ;;  %v1158_v41 = vpop.f32.mrb[7].mxu1 }
 0x213   : > { %v843_v46 = vpop.f32.mrb[8].mxu1 }
 0x214   : > { %v850_v49 = vadd.f32 %v843_v46, %v732_v37  ;;  %v1197_v50 = vpop.f32.mrb[9].mxu1 }
 0x215   : > { %v846_v7 = vpop.f32.mrb[10].mxu1 }
 0x216   : > { %v859_v52 = vadd.f32 %v1054_v47, %v850_v49  ;;  %v851_v8 = vadd.f32 %v846_v7, %v735_v40  ;;  %v1198_v53 = vpop.f32.mrb[11].mxu1 }
 0x218   : > { %v875_v54 = vadd.f32 %v870_v51, %v859_v52  ;;  %v860_v55 = vadd.f32 %v1054_v47, %v851_v8 }
 0x21a   : > { %v877_v56 = vmax.f32 %v875_v54, 0.0  ;;  %v876_v57 = vadd.f32 %v872_v9, %v860_v55 }
 0x21c   : > { %879 = vst.msk [vmem:[%s217_s9] sm:$0xff] %vm289_vm1, %v877_v56  ;;  %v878_v58 = vmax.f32 %v876_v57, 0.0 }
 0x21e   : > { %880 = vst.msk [vmem:[%s217_s9 + $0x8] sm:$0xff] %vm289_vm1, %v878_v58 }
 0x21f   : > { %1295 = shalt.err (!%p1292_p3)
}
 0x220   : > { %s1296_s23 = scalar_lea.hbm %s1624_s13, 256  ;;  %s1300_s30 = scalar_lea.hbm %s1676_s5, 512 }
 0x221   : > { %p1297_p4 = scmp.ne.s32.totalorder %s1624_s13, %s1296_s23  ;;  %p1301_p9 = scmp.lt.u32.totalorder %s1624_s13, %s1676_s5 }
 0x222   : > { %p1302_p10 = scmp.lt.u32.totalorder %s1300_s30, %s1296_s23  ;;  %p1304_p12 = scmp.lt.u32.totalorder %s1296_s23, %s1624_s13 }
 0x223   : > { %p1298_p7 = pnand %p1297_p4, %p1419_p5 }
 0x224   : > { %p1303_p11 = por %p1302_p10, %p1301_p9 }
 0x225   : > { %p1299_p8 = pneg %p1298_p7 }
 0x226   : > { %p1305_p13 = por %p1304_p12, %p1303_p11 }
 0x228   : > { %p1306_p0 = pnand %p1305_p13, %p1299_p8 }
 0x22a   : > { %1309 = shalt.err (!%p1306_p0)
}
 0x22b   : > { %s1349_s8 = smov 128   ;;  %s1350_s9 = smov 8  }
 0x22c   : > { %1200 = dma.vmem_to_hbm [thread:$0]  (%p1419_p5), %s1626_s10, 256, %s1624_s13, %s1630_s22, %s1349_s8, %s1349_s8, %s1350_s9  }
 0x22d PF: > { %p1206_p1 = scmp.ge.s32.totalorder %s1344_s21, 2  ;;  %s910_s11 = sand.u32 1, %s1332_s18  }
 0x22e   : > { %s911_s12 = scalar_lea.sflag [#allocation3], %s910_s11 }
 0x22f   : > { %p1203_p2 = pnand %p1206_p1, %p1423_p6 }
 0x231   : > { %1327 = dma.done.wait (!%p1203_p2), %s911_s12, 256  }
 0x232   : > { %1329 = vsyncadd (!%p1203_p2), %s911_s12, 4294967040  ;;  %p15_p3 = scmp.ge.s32.totalorder %s1406_s24, 4   ;;  %s1679_s18 = smov %s1336_s19 }
 0x233   : > { %s1680_s19 = smov %s1340_s20  ;;  %s1681_s20 = smov %s1417_s27 }
 0x234   : > { %s1682_s21 = smov %s1406_s24  ;;  %17 = sbr.rel (!%p15_p3) target bundleno = 3 (0x3), region = 79 }
 0x23b   :  { %916 = vsyncpa [#allocation3], 1 }
 0x23c   :  { %918 = vsyncpa [#allocation3 + $0x1], 1 }

</bundles_post_ra>
